<compile_context>
chip_gen: v6e
topology: v6e:2x2x1
jax: 0.10.0
libtpu: 0.0.40
codegen_flags: <defaults>
</compile_context>

<pallas_src>
import math

import numpy as np
import jax
import jax.numpy as jnp
from jax.experimental import pallas as pl
from jax.experimental.pallas import tpu as pltpu

BN_EPS = 1e-5
_NEG = np.float32(-3.0e38)   # additive "-inf" surrogate for max-pool edge masking


# ---------------------------------------------------------------------------
# trace-time constants for the separable 3x3 pooling windows
# ---------------------------------------------------------------------------
def _pool_constants(H, W):
    """(8, H*W) mask bank + (1, H*W) inverse-count map (count_include_pad=False)."""
    HW = H * W
    lane = np.arange(HW)
    wi = lane % W
    hi = lane // W
    # neighbour-validity masks (1 where the shifted neighbour exists)
    m_wp = (wi <= W - 2).astype(np.float32)[None, :]   # (h, w+1)
    m_wm = (wi >= 1).astype(np.float32)[None, :]       # (h, w-1)
    m_hp = (hi <= H - 2).astype(np.float32)[None, :]   # (h+1, w)
    m_hm = (hi >= 1).astype(np.float32)[None, :]       # (h-1, w)
    add = lambda m: ((1.0 - m) * _NEG).astype(np.float32)   # 0 valid / -3e38 invalid
    masks = np.concatenate(
        [add(m_wp), add(m_wm), add(m_hp), add(m_hm),   # rows 0-3: additive (max pool)
         m_wp, m_wm, m_hp, m_hm],                      # rows 4-7: multiplicative (avg sum)
        axis=0).astype(np.float32)                     # (8, HW)
    inv_cnt = (1.0 / ((1.0 + m_wp + m_wm) * (1.0 + m_hp + m_hm))).astype(np.float32)
    return masks, inv_cnt                              # (8, HW), (1, HW)


# ---------------------------------------------------------------------------
# block-layout choice: samples per grid step + 8-sublane-aligned sample groups
# ---------------------------------------------------------------------------
def _choose_layout(N, C):
    group_rows = (C * 8) // math.gcd(C, 8)             # lcm(C, 8): sublane-aligned group
    spg = group_rows // C                               # samples per group
    if N % spg != 0:
        group_rows, spg = C, 1                          # per-sample groups (still correct)
    max_rows = 2048                                     # ~2 MiB f32 block at HW=256
    max_groups = 32                                     # bound the conv's Python unroll
    cap = min(N, max(spg, max_rows // max(C, 1)), max_groups * spg)
    spb = spg
    for cand in range(cap, spg - 1, -1):                # largest multiple of spg dividing N
        if cand % spg == 0 and N % cand == 0:
            spb = cand
            break
    return spb, group_rows


# ---------------------------------------------------------------------------
# kernel
# ---------------------------------------------------------------------------
def _make_kernel(H, W, group_rows, n_groups):
    HW = H * W

    def kernel(scal_ref, masks_ref, invc_ref, wexp_ref, x_ref, o_ref):
        # scal_ref : SMEM (2,)                 [w0*bn, w2]
        # masks_ref: VMEM (8, HW)              additive + multiplicative edge masks
        # invc_ref : VMEM (1, HW)              inv_count * w1 * bn (avg pool, folded)
        # wexp_ref : VMEM (group_rows, group_rows) block-diag conv weight * w_sel * bn
        # x_ref    : VMEM (rows, HW)           rows = samples_per_block * C
        # o_ref    : VMEM (rows, HW)
        x = x_ref[...].astype(jnp.float32)                     # (rows, HW)
        masks = masks_ref[...]
        add_wp = masks[0:1, :]
        add_wm = masks[1:2, :]
        add_hp = masks[2:3, :]
        add_hm = masks[3:4, :]
        m_wp = masks[4:5, :]
        m_wm = masks[5:6, :]
        m_hp = masks[6:7, :]
        m_hm = masks[7:8, :]

        # ---- separable 3x3 window, pass 1: along W (circular lane rolls) ----
        x_e = pltpu.roll(x, shift=HW - 1, axis=1)              # x[h, w+1]
        x_w = pltpu.roll(x, shift=1, axis=1)                   # x[h, w-1]
        row_max = jnp.maximum(x, jnp.maximum(x_e + add_wp, x_w + add_wm))
        row_sum = x + x_e * m_wp + x_w * m_wm

        # ---- pass 2: along H (roll by +-W in the flattened H*W dim) ----
        rm_s = pltpu.roll(row_max, shift=HW - W, axis=1)       # row_max[h+1, w]
        rm_n = pltpu.roll(row_max, shift=W, axis=1)            # row_max[h-1, w]
        mp = jnp.maximum(row_max, jnp.maximum(rm_s + add_hp, rm_n + add_hm))
        rs_s = pltpu.roll(row_sum, shift=HW - W, axis=1)
        rs_n = pltpu.roll(row_sum, shift=W, axis=1)
        s = row_sum + rs_s * m_hp + rs_n * m_hm

        # max_pool*w0*bn + avg_pool*w1*bn (folded into invc) + skip*w2
        base = scal_ref[0] * mp + s * invc_ref[...] + scal_ref[1] * x

        # ---- _ops[3][m]: ReLU -> 1x1 conv -> BN (folded weight, block-diag groups) ----
        # TODO(synk): for large C (>=128) route this through the MXU instead.
        xr = jnp.maximum(x, 0.0)
        wexp = wexp_ref[...]
        for g in range(n_groups):
            r0 = g * group_rows
            xg = xr[r0:r0 + group_rows, :]                     # (group_rows, HW)
            acc = xg[0:1, :] * wexp[:, 0:1]
            for j in range(1, group_rows):
                acc = acc + xg[j:j + 1, :] * wexp[:, j:j + 1]
            o_ref[r0:r0 + group_rows, :] = (
                base[r0:r0 + group_rows, :] + acc).astype(o_ref.dtype)

    return kernel


def _run_mixed_kernel(x2, scal, masks, invc, wexp, C, H, W, spb, group_rows):
    R, HW = x2.shape
    block_rows = spb * C
    n_groups = block_rows // group_rows
    kernel = _make_kernel(H, W, group_rows, n_groups)
    return pl.pallas_call(
        kernel,
        out_shape=jax.ShapeDtypeStruct((R, HW), x2.dtype),
        grid=(R // block_rows,),
        in_specs=[
            pl.BlockSpec(memory_space=pltpu.MemorySpace.SMEM),          # (2,) scalars
            pl.BlockSpec((8, HW), lambda b: (0, 0)),                    # mask bank
            pl.BlockSpec((1, HW), lambda b: (0, 0)),                    # inv_count * w1 * bn
            pl.BlockSpec((group_rows, group_rows), lambda b: (0, 0)),   # block-diag conv w
            pl.BlockSpec((block_rows, HW), lambda b: (b, 0)),           # x slab
        ],
        out_specs=pl.BlockSpec((block_rows, HW), lambda b: (b, 0)),
        compiler_params=pltpu.CompilerParams(
            dimension_semantics=("parallel",),
        ),
    )(scal, masks, invc, wexp, x2)


# ---------------------------------------------------------------------------
# host-side op selection (mirrors torch's .data.cpu().numpy() + np.random path)
# ---------------------------------------------------------------------------
def _select_subop(w_np, T, S, n, E):
    if T:
        if S:
            t1 = 0.8 * (70 - E) / 70 + 0.1
            if t1 <= 0:
                t1 = 0
            p1 = np.random.choice([0, 1], p=[1 - t1, t1])
            if p1:
                p2 = np.random.choice([0, 1], p=[0.05, 0.95])
                if p2:
                    return 0, 3
                return n, 3 + n
            m = int(np.argmax(w_np[3:-1]))
            return m, 3 + m
        t = 0.8 * (70 - E) / 70 + 0.1
        if t <= 0:
            t = 0
        p = np.random.choice([0, 1], p=[1 - t, t])
        if p:
            return n, 3 + n
        m = int(np.argmax(w_np[3:-1]))
        return m, 3 + m
    m = int(np.argmax(w_np[3:-1]))
    return m, 3 + m


def mmixed_op_forward(x_nchw, weights, conv_ws, V, T, S, n, E=0):
    """Replicates MMixedOp.forward.

    x_nchw : (N, C, H, W) float32
    weights: (8,) arch weights; [:3] -> ops 0..2, [3:7] -> the 4 sub-ops of _ops[3]
    conv_ws: (4, C, C) float32, sub-op 1x1-conv weights laid out (C_out, C_in)
    The stochastic / argmax branching (T, S, n, E) is host-side, as in PyTorch.
    """
    w_np = np.asarray(weights, dtype=np.float32)       # single host read of the weights
    sel, widx = _select_subop(w_np, T, S, n, E)

    N, C, H, W = x_nchw.shape
    bn = np.float32(1.0 / np.sqrt(1.0 + BN_EPS))       # eval-mode BN (mean=0, var=1)

    spb, group_rows = _choose_layout(N, C)
    spg = group_rows // C

    # Fold BN + architecture weights host-side.
    scal = jnp.asarray([w_np[0] * bn, w_np[2]], dtype=jnp.float32)
    cw = jnp.asarray(conv_ws[sel], jnp.float32) * jnp.float32(w_np[widx] * bn)
    wexp = jnp.kron(jnp.eye(spg, dtype=jnp.float32), cw)          # block-diag (group_rows^2)

    masks_np, invc_np = _pool_constants(H, W)
    masks = jnp.asarray(masks_np)
    invc = jnp.asarray(invc_np * np.float32(w_np[1] * bn))

    # NCHW kept end-to-end; flattening to (N*C, H*W) is a free reshape.
    x2 = x_nchw.reshape(N * C, H * W)
    out2 = _run_mixed_kernel(x2, scal, masks, invc, wexp, C, H, W, spb, group_rows)
    return out2.reshape(N, C, H, W)


# ---------------------------------------------------------------------------
# pure-JAX reference (same stand-in op bank) for a correctness check
# ---------------------------------------------------------------------------
def _reference_forward(x, w_np, sel, widx, conv_ws):
    bn = np.float32(1.0 / np.sqrt(1.0 + BN_EPS))
    mp = jax.lax.reduce_window(x, -jnp.inf, jax.lax.max,
                               (1, 1, 3, 3), (1, 1, 1, 1), "SAME")
    sm = jax.lax.reduce_window(x, 0.0, jax.lax.add,
                               (1, 1, 3, 3), (1, 1, 1, 1), "SAME")
    cnt = jax.lax.reduce_window(jnp.ones_like(x), 0.0, jax.lax.add,
                                (1, 1, 3, 3), (1, 1, 1, 1), "SAME")
    ap = sm / cnt
    xr = jnp.maximum(x, 0.0)
    conv = jnp.einsum("oc,nchw->nohw", conv_ws[sel].astype(jnp.float32), xr,
                      precision=jax.lax.Precision.HIGHEST)
    return (w_np[0] * bn * mp + w_np[1] * bn * ap + w_np[2] * x
            + w_np[widx] * bn * conv)


if __name__ == "__main__":
    key = jax.random.PRNGKey(0)
    kx, ka, kc = jax.random.split(key, 3)

    N, C, H, W = 2, 4, 16, 16
    x = jax.random.normal(kx, (N, C, H, W), jnp.float32)

    # architecture weights: 3 (fixed ops) + 4 (sub-ops of op 3) + 1 (unused tail) = 8
    alphas = jax.random.normal(ka, (8,), jnp.float32)
    weights = jax.nn.softmax(alphas)

    # 1x1-conv weight bank for _ops[3], stored as (C_out, C_in)
    conv_ws = 0.1 * jax.random.normal(kc, (4, C, C), jnp.float32)

    np.random.seed(0)  # deterministic host-side sampling branches
    out = mmixed_op_forward(x, weights, conv_ws, V=None, T=True, S=True, n=1, E=10)
    out = jax.block_until_ready(out)

    assert out.shape == (N, C, H, W)
    assert bool(jnp.all(jnp.isfinite(out)))

    # correctness check against a pure-JAX reference (same RNG seed -> same branch)
    np.random.seed(0)
    w_np = np.asarray(weights, dtype=np.float32)
    sel, widx = _select_subop(w_np, T=True, S=True, n=1, E=10)
    ref = jax.block_until_ready(_reference_forward(x, w_np, sel, widx, conv_ws))
    np.testing.assert_allclose(np.asarray(out), np.asarray(ref), rtol=1e-4, atol=1e-5)

    print("KERNEL_OK")
</pallas_src>

<mosaic_0001>
module attributes {stable_mosaic.version = 11 : i64} {
  func.func @kernel(%arg0: i32, %arg1: memref<2xf32, #tpu.memory_space<smem>>, %arg2: memref<8x256xf32, #tpu.memory_space<vmem>>, %arg3: memref<1x256xf32, #tpu.memory_space<vmem>>, %arg4: memref<8x8xf32, #tpu.memory_space<vmem>>, %arg5: memref<8x256xf32, #tpu.memory_space<vmem>>, %arg6: memref<8x256xf32, #tpu.memory_space<vmem>>) attributes {dimension_semantics = [#tpu.dimension_semantics<parallel>], iteration_bounds = array<i64: 1>, scalar_prefetch = 0 : i64, scratch_operands = 0 : i64, tpu.core_type = #tpu.core_type<tc>, window_params = [{transform_indices = @transform_0, window_bounds = array<i64: 2>}, {pipeline_mode = #tpu.pipeline_mode<synchronous>, transform_indices = @transform_1, window_bounds = array<i64: 8, 256>}, {pipeline_mode = #tpu.pipeline_mode<synchronous>, transform_indices = @transform_2, window_bounds = array<i64: 1, 256>}, {pipeline_mode = #tpu.pipeline_mode<synchronous>, transform_indices = @transform_3, window_bounds = array<i64: 8, 8>}, {transform_indices = @transform_4, window_bounds = array<i64: 8, 256>}, {transform_indices = @transform_5, window_bounds = array<i64: 8, 256>}]} {
    %c0 = arith.constant 0 : index
    %c0_0 = arith.constant 0 : index
    %0 = vector.load %arg5[%c0, %c0_0] : memref<8x256xf32, #tpu.memory_space<vmem>>, vector<8x256xf32>
    %c0_1 = arith.constant 0 : index
    %c0_2 = arith.constant 0 : index
    %1 = vector.load %arg2[%c0_1, %c0_2] : memref<8x256xf32, #tpu.memory_space<vmem>>, vector<8x256xf32>
    %2 = vector.extract_strided_slice %1 {offsets = [0, 0], sizes = [1, 256], strides = [1, 1]} : vector<8x256xf32> to vector<1x256xf32>
    %3 = vector.extract_strided_slice %1 {offsets = [1, 0], sizes = [1, 256], strides = [1, 1]} : vector<8x256xf32> to vector<1x256xf32>
    %4 = vector.extract_strided_slice %1 {offsets = [2, 0], sizes = [1, 256], strides = [1, 1]} : vector<8x256xf32> to vector<1x256xf32>
    %5 = vector.extract_strided_slice %1 {offsets = [3, 0], sizes = [1, 256], strides = [1, 1]} : vector<8x256xf32> to vector<1x256xf32>
    %6 = vector.extract_strided_slice %1 {offsets = [4, 0], sizes = [1, 256], strides = [1, 1]} : vector<8x256xf32> to vector<1x256xf32>
    %7 = vector.extract_strided_slice %1 {offsets = [5, 0], sizes = [1, 256], strides = [1, 1]} : vector<8x256xf32> to vector<1x256xf32>
    %8 = vector.extract_strided_slice %1 {offsets = [6, 0], sizes = [1, 256], strides = [1, 1]} : vector<8x256xf32> to vector<1x256xf32>
    %9 = vector.extract_strided_slice %1 {offsets = [7, 0], sizes = [1, 256], strides = [1, 1]} : vector<8x256xf32> to vector<1x256xf32>
    %c255_i32 = arith.constant 255 : i32
    %10 = tpu.dynamic_rotate %0 by %c255_i32 dim 1 : vector<8x256xf32>, i32 -> vector<8x256xf32>
    %c1_i32 = arith.constant 1 : i32
    %11 = tpu.dynamic_rotate %0 by %c1_i32 dim 1 : vector<8x256xf32>, i32 -> vector<8x256xf32>
    %12 = vector.broadcast %2 : vector<1x256xf32> to vector<8x256xf32>
    %13 = arith.addf %10, %12 : vector<8x256xf32>
    %14 = vector.broadcast %3 : vector<1x256xf32> to vector<8x256xf32>
    %15 = arith.addf %11, %14 : vector<8x256xf32>
    %16 = arith.maximumf %13, %15 : vector<8x256xf32>
    %17 = arith.maximumf %0, %16 : vector<8x256xf32>
    %18 = vector.broadcast %6 : vector<1x256xf32> to vector<8x256xf32>
    %19 = arith.mulf %10, %18 : vector<8x256xf32>
    %20 = arith.addf %0, %19 : vector<8x256xf32>
    %21 = vector.broadcast %7 : vector<1x256xf32> to vector<8x256xf32>
    %22 = arith.mulf %11, %21 : vector<8x256xf32>
    %23 = arith.addf %20, %22 : vector<8x256xf32>
    %c240_i32 = arith.constant 240 : i32
    %24 = tpu.dynamic_rotate %17 by %c240_i32 dim 1 : vector<8x256xf32>, i32 -> vector<8x256xf32>
    %c16_i32 = arith.constant 16 : i32
    %25 = tpu.dynamic_rotate %17 by %c16_i32 dim 1 : vector<8x256xf32>, i32 -> vector<8x256xf32>
    %26 = vector.broadcast %4 : vector<1x256xf32> to vector<8x256xf32>
    %27 = arith.addf %24, %26 : vector<8x256xf32>
    %28 = vector.broadcast %5 : vector<1x256xf32> to vector<8x256xf32>
    %29 = arith.addf %25, %28 : vector<8x256xf32>
    %30 = arith.maximumf %27, %29 : vector<8x256xf32>
    %31 = arith.maximumf %17, %30 : vector<8x256xf32>
    %c240_i32_3 = arith.constant 240 : i32
    %32 = tpu.dynamic_rotate %23 by %c240_i32_3 dim 1 : vector<8x256xf32>, i32 -> vector<8x256xf32>
    %c16_i32_4 = arith.constant 16 : i32
    %33 = tpu.dynamic_rotate %23 by %c16_i32_4 dim 1 : vector<8x256xf32>, i32 -> vector<8x256xf32>
    %34 = vector.broadcast %8 : vector<1x256xf32> to vector<8x256xf32>
    %35 = arith.mulf %32, %34 : vector<8x256xf32>
    %36 = arith.addf %23, %35 : vector<8x256xf32>
    %37 = vector.broadcast %9 : vector<1x256xf32> to vector<8x256xf32>
    %38 = arith.mulf %33, %37 : vector<8x256xf32>
    %39 = arith.addf %36, %38 : vector<8x256xf32>
    %c0_5 = arith.constant 0 : index
    %40 = memref.load %arg1[%c0_5] : memref<2xf32, #tpu.memory_space<smem>>
    %41 = vector.broadcast %40 : f32 to vector<8x256xf32>
    %42 = arith.mulf %41, %31 : vector<8x256xf32>
    %c0_6 = arith.constant 0 : index
    %c0_7 = arith.constant 0 : index
    %43 = vector.load %arg3[%c0_6, %c0_7] : memref<1x256xf32, #tpu.memory_space<vmem>>, vector<1x256xf32>
    %44 = vector.broadcast %43 : vector<1x256xf32> to vector<8x256xf32>
    %45 = arith.mulf %39, %44 : vector<8x256xf32>
    %46 = arith.addf %42, %45 : vector<8x256xf32>
    %c1 = arith.constant 1 : index
    %47 = memref.load %arg1[%c1] : memref<2xf32, #tpu.memory_space<smem>>
    %48 = vector.broadcast %47 : f32 to vector<8x256xf32>
    %49 = arith.mulf %48, %0 : vector<8x256xf32>
    %50 = arith.addf %46, %49 : vector<8x256xf32>
    %cst = arith.constant 0.000000e+00 : f32
    %51 = vector.broadcast %cst : f32 to vector<8x256xf32>
    %52 = arith.maximumf %0, %51 : vector<8x256xf32>
    %c0_8 = arith.constant 0 : index
    %c0_9 = arith.constant 0 : index
    %53 = vector.load %arg4[%c0_8, %c0_9] : memref<8x8xf32, #tpu.memory_space<vmem>>, vector<8x8xf32>
    %54 = vector.extract_strided_slice %52 {offsets = [0, 0], sizes = [1, 256], strides = [1, 1]} : vector<8x256xf32> to vector<1x256xf32>
    %55 = vector.extract_strided_slice %53 {offsets = [0, 0], sizes = [8, 1], strides = [1, 1]} : vector<8x8xf32> to vector<8x1xf32>
    %56 = vector.broadcast %54 : vector<1x256xf32> to vector<8x256xf32>
    %57 = vector.broadcast %55 : vector<8x1xf32> to vector<8x256xf32>
    %58 = arith.mulf %56, %57 : vector<8x256xf32>
    %59 = vector.extract_strided_slice %52 {offsets = [1, 0], sizes = [1, 256], strides = [1, 1]} : vector<8x256xf32> to vector<1x256xf32>
    %60 = vector.extract_strided_slice %53 {offsets = [0, 1], sizes = [8, 1], strides = [1, 1]} : vector<8x8xf32> to vector<8x1xf32>
    %61 = vector.broadcast %59 : vector<1x256xf32> to vector<8x256xf32>
    %62 = vector.broadcast %60 : vector<8x1xf32> to vector<8x256xf32>
    %63 = arith.mulf %61, %62 : vector<8x256xf32>
    %64 = arith.addf %58, %63 : vector<8x256xf32>
    %65 = vector.extract_strided_slice %52 {offsets = [2, 0], sizes = [1, 256], strides = [1, 1]} : vector<8x256xf32> to vector<1x256xf32>
    %66 = vector.extract_strided_slice %53 {offsets = [0, 2], sizes = [8, 1], strides = [1, 1]} : vector<8x8xf32> to vector<8x1xf32>
    %67 = vector.broadcast %65 : vector<1x256xf32> to vector<8x256xf32>
    %68 = vector.broadcast %66 : vector<8x1xf32> to vector<8x256xf32>
    %69 = arith.mulf %67, %68 : vector<8x256xf32>
    %70 = arith.addf %64, %69 : vector<8x256xf32>
    %71 = vector.extract_strided_slice %52 {offsets = [3, 0], sizes = [1, 256], strides = [1, 1]} : vector<8x256xf32> to vector<1x256xf32>
    %72 = vector.extract_strided_slice %53 {offsets = [0, 3], sizes = [8, 1], strides = [1, 1]} : vector<8x8xf32> to vector<8x1xf32>
    %73 = vector.broadcast %71 : vector<1x256xf32> to vector<8x256xf32>
    %74 = vector.broadcast %72 : vector<8x1xf32> to vector<8x256xf32>
    %75 = arith.mulf %73, %74 : vector<8x256xf32>
    %76 = arith.addf %70, %75 : vector<8x256xf32>
    %77 = vector.extract_strided_slice %52 {offsets = [4, 0], sizes = [1, 256], strides = [1, 1]} : vector<8x256xf32> to vector<1x256xf32>
    %78 = vector.extract_strided_slice %53 {offsets = [0, 4], sizes = [8, 1], strides = [1, 1]} : vector<8x8xf32> to vector<8x1xf32>
    %79 = vector.broadcast %77 : vector<1x256xf32> to vector<8x256xf32>
    %80 = vector.broadcast %78 : vector<8x1xf32> to vector<8x256xf32>
    %81 = arith.mulf %79, %80 : vector<8x256xf32>
    %82 = arith.addf %76, %81 : vector<8x256xf32>
    %83 = vector.extract_strided_slice %52 {offsets = [5, 0], sizes = [1, 256], strides = [1, 1]} : vector<8x256xf32> to vector<1x256xf32>
    %84 = vector.extract_strided_slice %53 {offsets = [0, 5], sizes = [8, 1], strides = [1, 1]} : vector<8x8xf32> to vector<8x1xf32>
    %85 = vector.broadcast %83 : vector<1x256xf32> to vector<8x256xf32>
    %86 = vector.broadcast %84 : vector<8x1xf32> to vector<8x256xf32>
    %87 = arith.mulf %85, %86 : vector<8x256xf32>
    %88 = arith.addf %82, %87 : vector<8x256xf32>
    %89 = vector.extract_strided_slice %52 {offsets = [6, 0], sizes = [1, 256], strides = [1, 1]} : vector<8x256xf32> to vector<1x256xf32>
    %90 = vector.extract_strided_slice %53 {offsets = [0, 6], sizes = [8, 1], strides = [1, 1]} : vector<8x8xf32> to vector<8x1xf32>
    %91 = vector.broadcast %89 : vector<1x256xf32> to vector<8x256xf32>
    %92 = vector.broadcast %90 : vector<8x1xf32> to vector<8x256xf32>
    %93 = arith.mulf %91, %92 : vector<8x256xf32>
    %94 = arith.addf %88, %93 : vector<8x256xf32>
    %95 = vector.extract_strided_slice %52 {offsets = [7, 0], sizes = [1, 256], strides = [1, 1]} : vector<8x256xf32> to vector<1x256xf32>
    %96 = vector.extract_strided_slice %53 {offsets = [0, 7], sizes = [8, 1], strides = [1, 1]} : vector<8x8xf32> to vector<8x1xf32>
    %97 = vector.broadcast %95 : vector<1x256xf32> to vector<8x256xf32>
    %98 = vector.broadcast %96 : vector<8x1xf32> to vector<8x256xf32>
    %99 = arith.mulf %97, %98 : vector<8x256xf32>
    %100 = arith.addf %94, %99 : vector<8x256xf32>
    %101 = arith.addf %50, %100 : vector<8x256xf32>
    %c0_10 = arith.constant 0 : index
    %c0_11 = arith.constant 0 : index
    %102 = vector.load %arg6[%c0_10, %c0_11] : memref<8x256xf32, #tpu.memory_space<vmem>>, vector<8x256xf32>
    tpu.vector_store %arg6[%c0_10, %c0_11], %101 {strides = array<i32>} : memref<8x256xf32, #tpu.memory_space<vmem>>, vector<8x256xf32>,
    return
  }
  func.func @transform_0(%arg0: i32) -> i32 {
    %c0_i32 = arith.constant 0 : i32
    %c0_i32_0 = arith.constant 0 : i32
    return %c0_i32 : i32
  }
  func.func @transform_1(%arg0: i32) -> (i32, i32) {
    %c0_i32 = arith.constant 0 : i32
    %c0_i32_0 = arith.constant 0 : i32
    %c0_i32_1 = arith.constant 0 : i32
    return %c0_i32, %c0_i32_0 : i32, i32
  }
  func.func @transform_2(%arg0: i32) -> (i32, i32) {
    %c0_i32 = arith.constant 0 : i32
    %c0_i32_0 = arith.constant 0 : i32
    %c0_i32_1 = arith.constant 0 : i32
    return %c0_i32, %c0_i32_0 : i32, i32
  }
  func.func @transform_3(%arg0: i32) -> (i32, i32) {
    %c0_i32 = arith.constant 0 : i32
    %c0_i32_0 = arith.constant 0 : i32
    %c0_i32_1 = arith.constant 0 : i32
    return %c0_i32, %c0_i32_0 : i32, i32
  }
  func.func @transform_4(%arg0: i32) -> (i32, i32) {
    %c0_i32 = arith.constant 0 : i32
    %c0_i32_0 = arith.constant 0 : i32
    return %arg0, %c0_i32 : i32, i32
  }
  func.func @transform_5(%arg0: i32) -> (i32, i32) {
    %c0_i32 = arith.constant 0 : i32
    %c0_i32_0 = arith.constant 0 : i32
    return %arg0, %c0_i32 : i32, i32
  }
}

</mosaic_0001>

<bundles_post_ra>
// kernel: tpu_custom_call.1
= control target key start
LH: loop header
LB: loop body
LE: loop exit
PB: predicated region body
PF: predicated region fallthrough
CT: control target
= control target key end

     0   :  { %10 = vsyncpa [#allocation5], 0  ;;  %s736_s0 = inlined_call_operand.hbm [shape: f32[2], index: 0, kind: input, shape index: {}]   ;;  %s737_s1 = inlined_call_operand.hbm [shape: f32[8,256], index: 1, kind: input, shape index: {}]   ;;  %s738_s2 = inlined_call_operand.vmem [shape: f32[1,256], index: 2, kind: input, shape index: {}]   ;;  %s739_s3 = inlined_call_operand.hbm [shape: f32[8,8], index: 3, kind: input, shape index: {}]   ;;  %s740_s4 = inlined_call_operand.hbm [shape: f32[8,256], index: 4, kind: input, shape index: {}]   ;;  %s741_s5 = inlined_call_operand.hbm [shape: f32[8,256], index: 5, kind: output, shape index: {}]  }
   0x1   :  { %11 = vsyncpa [#allocation3], 0 }
   0x2   :  { %12 = vsyncpa [#allocation8], 0 }
   0x3   :  { %13 = vsyncpa [#allocation4], 0  ;;  %s509_s18 = smov [#allocation7]   ;;  %s510_s20 = smov [#allocation6]  }
   0x4   :  { %s40_s19 = sshll.u32 %s509_s18, 4  ;;  %s28_s21 = sshll.u32 %s510_s20, 4  ;;  %s41_s19 = int_to_ptr.vmem [resolvable:$true] %s40_s19  ;;  %s29_s21 = int_to_ptr.vmem [resolvable:$true] %s28_s21 }
   0x5   :  { %s421_s22 = scalar_lea.vmem %s41_s19, 128  ;;  %p426_p1 = scmp.lt.s32.totalorder %s41_s19, %s41_s19 }
   0x6   :  { %p422_p0 = scmp.ne.s32.totalorder %s41_s19, %s421_s22  ;;  %p427_p2 = scmp.lt.s32.totalorder %s421_s22, %s421_s22 }
   0x8   :  { %p428_p3 = por %p427_p2, %p426_p1 }
   0xa   :  { %p429_p4 = pnand %p428_p3, %p422_p0 }
   0xc   :  { %432 = shalt.err (!%p429_p4)
}
   0xd   :  { %43 = dma.hbm_to_vmem [thread:$0]  %s739_s3, 128, %s41_s19, [#allocation8]  }
   0xe   :  { %s511_s25 = smov [#allocation2]   ;;  %s449_s28 = scalar_lea.vmem %s29_s21, 256 }
   0xf   :  { %21 = dma.hbm_to_smem %s736_s0, 16, %s511_s25, [#allocation5]  }
  0x10   :  { %p450_p5 = scmp.ne.s32.totalorder %s29_s21, %s449_s28  ;;  %p454_p6 = scmp.lt.s32.totalorder %s29_s21, %s29_s21 }
  0x11   :  { %p455_p7 = scmp.lt.s32.totalorder %s449_s28, %s449_s28 }
  0x13   :  { %p456_p8 = por %p455_p7, %p454_p6 }
  0x15   :  { %p457_p9 = pnand %p456_p8, %p450_p5 }
  0x17   :  { %460 = shalt.err (!%p457_p9)
}
  0x18   :  { %31 = dma.hbm_to_vmem [thread:$0]  %s737_s1, 256, %s29_s21, [#allocation3]  }
  0x19   :  { %s512_s6 = smov [#allocation9]  }
  0x1a   :  { %s50_s7 = sshll.u32 %s512_s6, 4  ;;  %s51_s7 = int_to_ptr.vmem [resolvable:$true] %s50_s7 }
  0x1b   :  { %s469_s3 = scalar_lea.vmem %s51_s7, 256  ;;  %p474_p11 = scmp.lt.s32.totalorder %s51_s7, %s51_s7 }
  0x1c   :  { %p470_p10 = scmp.ne.s32.totalorder %s51_s7, %s469_s3  ;;  %p475_p12 = scmp.lt.s32.totalorder %s469_s3, %s469_s3 }
  0x1e   :  { %p476_p13 = por %p475_p12, %p474_p11 }
  0x20   :  { %p477_p0 = pnand %p476_p13, %p470_p10 }
  0x22   :  { %480 = shalt.err (!%p477_p0)
}
  0x23   :  { %53 = dma.hbm_to_vmem [thread:$0]  %s740_s4, 256, %s51_s7, [#allocation8]  }
  0x24   :  { %501 = dma.done.wait [#allocation5], 16  }
  0x25   :  { %502 = vsyncadd [#allocation5], 4294967280 }
  0x26   :  { %503 = dma.done.wait [#allocation3], 256  }
  0x27   :  { %504 = vsyncadd [#allocation3], 4294967040 }
  0x28   :  { %505 = dma.done.wait [#allocation8], 384  }
  0x29   :  { %506 = vsyncadd [#allocation8], 4294966912 }
  0x2a   :  { %66 = sfence }
  0x2b   :  { %v568_v0 = vld [vmem:[#allocation9] sm:$0xff]  ;;  %s513_s1 = smov 1   ;;  %s514_s9 = smov 127   ;;  %v572_v1 = vld [vmem:[#allocation9 + $0x8] sm:$0xff]  ;;  %v515_v2 = vmov 1   ;;  %v516_v3 = vmov 0   ;;  %v75_v11 = vlaneseq }
  0x2c   :  { %80 = vrot.lane.b32.xlu1 %v568_v0, %s513_s1  ;;  %71 = vrot.lane.b32.xlu0 %v568_v0, %s514_s9  ;;  %v576_v4 = vld [vmem:[#allocation7] sm:$0xff]  ;;  %v517_v5 = vmov 2   ;;  %v518_v6 = vmov 3   ;;  %v519_v7 = vmov 4   ;;  %v520_v8 = vmov 6   ;;  %v592_v15 = vld [vmem:[#allocation6] sm:$0xff] }
  0x2d   :  { %405 = vset.pattern.permute.xlu1 %v515_v2  ;;  %404 = vset.pattern.permute.xlu0 %v516_v3  ;;  %v521_v9 = vmov 5   ;;  %v522_v10 = vmov 7   ;;  %v585_v12 = vshrl.u32 %v75_v11, 7  ;;  %v587_v13 = vand.u32 127, %v75_v11  ;;  %v594_v16 = vld [vmem:[#allocation6 + $0x8] sm:$0xff]  ;;  %s523_s4 = smov 112  }
  0x2e   :  { %v620_v40 = vmax.f32 %v568_v0, 0.0  ;;  %v623_v41 = vmax.f32 %v572_v1, 0.0  ;;  %s524_s10 = smov 16   ;;  %s209_s11 = sld [smem:[#allocation2]] }
  0x2f   :  { %v590_v14 = vsub.s32 1, %v585_v12  ;;  %v597_v17 = vsub.s32 0, %v585_v12  ;;  %vm84_vm0 = vcmp.lt.s32.totalorder %v587_v13, 1  ;;  %vm77_vm1 = vcmp.lt.s32.totalorder %v587_v13, 127  ;;  %s386_s14 = sld [smem:[#allocation2 + $0x1]] }
  0x30   :  { %82 = vrot.lane.b32.xlu1 %v572_v1, %s513_s1  ;;  %73 = vrot.lane.b32.xlu0 %v572_v1, %s514_s9  ;;  %v610_v24 = vsub.s32 4, %v585_v12  ;;  %v617_v37 = vsub.s32 5, %v585_v12  ;;  %v632_v46 = vsub.s32 2, %v585_v12  ;;  %v651_v55 = vsub.s32 3, %v585_v12 }
  0x31   :  { %v100_v20 = vrot.slane %v592_v15, %v590_v14  ;;  %v104_v21 = vrot.slane %v594_v16, %v590_v14  ;;  %v90_v22 = vrot.slane %v592_v15, %v597_v17  ;;  %v94_v23 = vrot.slane %v594_v16, %v597_v17 }
  0x32   :  { %v114_v33 = vrot.slane %v592_v15, %v610_v24  ;;  %v118_v34 = vrot.slane %v594_v16, %v610_v24  ;;  %v126_v47 = vrot.slane %v592_v15, %v617_v37  ;;  %v130_v48 = vrot.slane %v594_v16, %v617_v37 }
  0x33   :  { %v260_v49 = vrot.slane %v623_v41, %v590_v14  ;;  %v256_v50 = vrot.slane %v620_v40, %v590_v14  ;;  %v245_v51 = vrot.slane %v623_v41, %v597_v17  ;;  %v241_v52 = vrot.slane %v620_v40, %v597_v17 }
  0x34   :  { %262 = vperm.xlu1 %405, %v576_v4   ;;  %248 = vperm.xlu0 %404, %v576_v4   ;;  %v276_v56 = vrot.slane %v623_v41, %v632_v46  ;;  %v272_v60 = vrot.slane %v620_v40, %v632_v46  ;;  %vm146_vm2 = vcmp.lt.s32.totalorder %v587_v13, 16  ;;  %vm139_vm3 = vcmp.lt.s32.totalorder %v587_v13, 112 }
  0x38   :  { %406 = vset.pattern.permute.xlu1 %v517_v5  ;;  %407 = vset.pattern.permute.xlu0 %v518_v6 }
  0x39   :  { %278 = vperm.xlu1 %406, %v576_v4   ;;  %294 = vperm.xlu0 %407, %v576_v4  }
  0x3d   :  { %408 = vset.pattern.permute.xlu1 %v519_v7  ;;  %410 = vset.pattern.permute.xlu0 %v520_v8  ;;  %v292_v7 = vrot.slane %v623_v41, %v651_v55  ;;  %v288_v8 = vrot.slane %v620_v40, %v651_v55 }
  0x3e   :  { %310 = vperm.xlu1 %408, %v576_v4  }
  0x42   :  { %409 = vset.pattern.permute.xlu1 %v521_v9 }
  0x43   :  { %326 = vperm.xlu1 %409, %v576_v4  }
  0x47   :  { %411 = vset.pattern.permute.xlu1 %v522_v10 }
  0x9e   :  { %v81_v18 = vpop.permute.xlu1 %80  ;;  %v72_v19 = vpop.permute.xlu0 %71 }
  0xa2   :  { %v83_v25 = vpop.permute.xlu1 %82  ;;  %v74_v26 = vpop.permute.xlu0 %73 }
  0xa3   :  { %v85_v27 = vsel %vm84_vm0, %v81_v18, %v83_v25  ;;  %v86_v28 = vsel %vm84_vm0, %v83_v25, %v81_v18  ;;  %v78_v29 = vsel %vm77_vm1, %v72_v19, %v74_v26  ;;  %v79_v30 = vsel %vm77_vm1, %v74_v26, %v72_v19 }
  0xa4   :  { %v105_v31 = vadd.f32 %v100_v20, %v86_v28  ;;  %v106_v32 = vadd.f32 %v104_v21, %v85_v27  ;;  %v95_v35 = vadd.f32 %v90_v22, %v78_v29  ;;  %v96_v36 = vadd.f32 %v94_v23, %v79_v30 }
  0xa5   :  { %v119_v42 = vmul.f32 %v114_v33, %v78_v29  ;;  %v120_v43 = vmul.f32 %v118_v34, %v79_v30  ;;  %v131_v57 = vmul.f32 %v126_v47, %v86_v28  ;;  %v132_v58 = vmul.f32 %v130_v48, %v85_v27 }
  0xa6   :  { %v107_v38 = vmax.f32 %v95_v35, %v105_v31  ;;  %v108_v39 = vmax.f32 %v96_v36, %v106_v32  ;;  %v308_v25 = vrot.slane %v623_v41, %v610_v24  ;;  %v304_v26 = vrot.slane %v620_v40, %v610_v24 }
  0xa7   :  { %v121_v53 = vadd.f32 %v119_v42, %v568_v0  ;;  %v122_v54 = vadd.f32 %v120_v43, %v572_v1  ;;  %v324_v34 = vrot.slane %v623_v41, %v617_v37  ;;  %v320_v24 = vrot.slane %v620_v40, %v617_v37 }
  0xa8   :  { %v626_v44 = vmax.f32 %v572_v1, %v108_v39  ;;  %v629_v45 = vmax.f32 %v568_v0, %v107_v38  ;;  %v199_v37 = vsub.s32 7, %v585_v12 }
  0xa9   :  { %v659_v5 = vadd.f32 %v132_v58, %v122_v54  ;;  %v661_v6 = vadd.f32 %v131_v57, %v121_v53 }
  0xaa   :  { %137 = vrot.lane.b32.xlu0 %v626_v44, %s523_s4  ;;  %135 = vrot.lane.b32.xlu1 %v629_v45, %s523_s4 }
  0xae   :  { %144 = vrot.lane.b32.xlu0 %v626_v44, %s524_s10  ;;  %142 = vrot.lane.b32.xlu1 %v629_v45, %s524_s10 }
  0xaf   :  { %v263_v59 = vpop.permute.xlu1 %262  ;;  %v249_v61 = vpop.permute.xlu0 %248 }
  0xb0   :  { %v265_v62 = vmul.f32 %v263_v59, %v256_v50  ;;  %v266_v63 = vmul.f32 %v263_v59, %v260_v49  ;;  %v251_v2 = vmul.f32 %v249_v61, %v241_v52  ;;  %v252_v3 = vmul.f32 %v249_v61, %v245_v51 }
  0xb1   :  { %v166_v52 = vrot.slane %v594_v16, %v651_v55  ;;  %v152_v59 = vrot.slane %v592_v15, %v632_v46 }
  0xb2   :  { %175 = vrot.lane.b32.xlu0 %v659_v5, %s523_s4  ;;  %173 = vrot.lane.b32.xlu1 %v661_v6, %s523_s4  ;;  %v267_v9 = vadd.f32 %v265_v62, %v251_v2  ;;  %v268_v11 = vadd.f32 %v266_v63, %v252_v3  ;;  %v200_v2 = vrot.slane %v592_v15, %v199_v37 }
  0xb3   :  { %v204_v3 = vrot.slane %v594_v16, %v199_v37 }
  0xb4   :  { %v279_v18 = vpop.permute.xlu1 %278  ;;  %v295_v19 = vpop.permute.xlu0 %294 }
  0xb5   :  { %v281_v20 = vmul.f32 %v279_v18, %v272_v60  ;;  %v282_v21 = vmul.f32 %v279_v18, %v276_v56  ;;  %v297_v22 = vmul.f32 %v295_v19, %v288_v8  ;;  %v298_v23 = vmul.f32 %v295_v19, %v292_v7 }
  0xb6   :  { %179 = vrot.lane.b32.xlu0 %v661_v6, %s524_s10  ;;  %181 = vrot.lane.b32.xlu1 %v659_v5, %s524_s10 }
  0xb7   :  { %v284_v27 = vadd.f32 %v282_v21, %v268_v11  ;;  %v283_v28 = vadd.f32 %v281_v20, %v267_v9 }
  0xb9   :  { %v311_v29 = vpop.permute.xlu1 %310  ;;  %v299_v30 = vadd.f32 %v297_v22, %v283_v28  ;;  %v300_v31 = vadd.f32 %v298_v23, %v284_v27 }
  0xba   :  { %v313_v32 = vmul.f32 %v311_v29, %v304_v26  ;;  %v314_v33 = vmul.f32 %v311_v29, %v308_v25  ;;  %342 = vperm.xlu0 %410, %v576_v4   ;;  %358 = vperm.xlu1 %411, %v576_v4   ;;  %v687_v4 = vsub.s32 6, %v585_v12 }
  0xbc   :  { %v315_v35 = vadd.f32 %v313_v32, %v299_v30  ;;  %v316_v36 = vadd.f32 %v314_v33, %v300_v31  ;;  %v188_v53 = vrot.slane %v592_v15, %v687_v4  ;;  %v192_v54 = vrot.slane %v594_v16, %v687_v4 }
  0xbe   :  { %v327_v38 = vpop.permute.xlu1 %326  ;;  %412 = vset.pattern.permute.xlu0 %v522_v10  ;;  %v162_v10 = vrot.slane %v592_v15, %v651_v55  ;;  %v156_v55 = vrot.slane %v594_v16, %v632_v46  ;;  %v213_v15 = vld [vmem:[%s738_s2] sm:$0x3]  ;;  %s525_s2 = smov [#allocation10]  }
  0xbf   :  { %v329_v39 = vmul.f32 %v327_v38, %v320_v24  ;;  %v330_v42 = vmul.f32 %v327_v38, %v324_v34  ;;  %v218_v29 = vrot.slane %v213_v15, %v597_v17  ;;  %v222_v30 = vrot.slane %v213_v15, %v590_v14  ;;  %s375_s15 = sshll.u32 %s525_s2, 4  ;;  %s376_s15 = int_to_ptr.vmem [resolvable:$true] %s375_s15 }
  0xc0   :  { %v210_v34 = vstv %s209_s11  ;;  %v352_v17 = vrot.slane %v620_v40, %v199_v37  ;;  %v230_v14 = vstv %s386_s14  ;;  %s481_s16 = scalar_lea.vmem %s376_s15, 256  ;;  %p486_p2 = scmp.lt.s32.totalorder %s376_s15, %s376_s15 }
  0xc1   :  { %v682_v43 = vadd.f32 %v329_v39, %v315_v35  ;;  %v684_v47 = vadd.f32 %v330_v42, %v316_v36  ;;  %v340_v36 = vrot.slane %v623_v41, %v687_v4  ;;  %p482_p1 = scmp.ne.s32.totalorder %s376_s15, %s481_s16  ;;  %p487_p3 = scmp.lt.s32.totalorder %s481_s16, %s481_s16 }
  0xc3   :  { %p488_p4 = por %p487_p3, %p486_p2 }
  0xc5   :  { %p489_p5 = pnand %p488_p4, %p482_p1 }
 0x11c   :  { %v136_v48 = vpop.permute.xlu1 %135  ;;  %v138_v49 = vpop.permute.xlu0 %137 }
 0x11d   :  { %v140_v62 = vsel %vm139_vm3, %v136_v48, %v138_v49  ;;  %v141_v63 = vsel %vm139_vm3, %v138_v49, %v136_v48  ;;  %v231_v49 = vmul.f32 %v230_v14, %v568_v0 }
 0x11e   :  { %v157_v20 = vadd.f32 %v152_v59, %v140_v62  ;;  %v158_v21 = vadd.f32 %v156_v55, %v141_v63 }
 0x120   :  { %v143_v50 = vpop.permute.xlu1 %142  ;;  %v145_v51 = vpop.permute.xlu0 %144 }
 0x121   :  { %v147_v56 = vsel %vm146_vm2, %v143_v50, %v145_v51  ;;  %v148_v57 = vsel %vm146_vm2, %v145_v51, %v143_v50  ;;  %v232_v50 = vmul.f32 %v230_v14, %v572_v1 }
 0x122   :  { %v167_v7 = vadd.f32 %v162_v10, %v148_v57  ;;  %v168_v8 = vadd.f32 %v166_v52, %v147_v56 }
 0x124   :  { %v174_v58 = vpop.permute.xlu1 %173  ;;  %v176_v12 = vpop.permute.xlu0 %175  ;;  %v169_v25 = vmax.f32 %v157_v20, %v167_v7  ;;  %v170_v26 = vmax.f32 %v158_v21, %v168_v8 }
 0x125   :  { %v177_v60 = vsel %vm139_vm3, %v174_v58, %v176_v12  ;;  %v178_v61 = vsel %vm139_vm3, %v176_v12, %v174_v58 }
 0x126   :  { %v193_v9 = vmul.f32 %v188_v53, %v177_v60  ;;  %v194_v11 = vmul.f32 %v192_v54, %v178_v61  ;;  %v171_v32 = vmax.f32 %v629_v45, %v169_v25  ;;  %v172_v33 = vmax.f32 %v626_v44, %v170_v26 }
 0x128   :  { %v182_v18 = vpop.permute.xlu1 %181  ;;  %v180_v19 = vpop.permute.xlu0 %179  ;;  %v195_v27 = vadd.f32 %v193_v9, %v661_v6  ;;  %v196_v28 = vadd.f32 %v194_v11, %v659_v5  ;;  %v336_v6 = vrot.slane %v620_v40, %v687_v4  ;;  %v356_v5 = vrot.slane %v623_v41, %v199_v37 }
 0x129   :  { %v183_v46 = vsel %vm146_vm2, %v180_v19, %v182_v18  ;;  %v184_v22 = vsel %vm146_vm2, %v182_v18, %v180_v19  ;;  %v211_v38 = vmul.f32 %v210_v34, %v171_v32  ;;  %v212_v39 = vmul.f32 %v210_v34, %v172_v33 }
 0x12a   :  { %v205_v16 = vmul.f32 %v200_v2, %v184_v22  ;;  %v206_v23 = vmul.f32 %v204_v3, %v183_v46 }
 0x12c   :  { %v207_v31 = vadd.f32 %v205_v16, %v195_v27  ;;  %v208_v13 = vadd.f32 %v206_v23, %v196_v28 }
 0x12e   :  { %v225_v24 = vmul.f32 %v218_v29, %v207_v31  ;;  %v226_v35 = vmul.f32 %v222_v30, %v208_v13 }
 0x130   :  { %v227_v48 = vadd.f32 %v225_v24, %v211_v38  ;;  %v228_v44 = vadd.f32 %v226_v35, %v212_v39 }
 0x132   :  { %v233_v54 = vadd.f32 %v231_v49, %v227_v48  ;;  %v234_v56 = vadd.f32 %v232_v50, %v228_v44 }
 0x135   :  { %v343_v42 = vpop.permute.xlu0 %342  ;;  %v359_v45 = vpop.permute.xlu1 %358 }
 0x136   :  { %v345_v51 = vmul.f32 %v343_v42, %v336_v6  ;;  %v346_v10 = vmul.f32 %v343_v42, %v340_v36  ;;  %v361_v52 = vmul.f32 %v359_v45, %v352_v17  ;;  %v362_v53 = vmul.f32 %v359_v45, %v356_v5 }
 0x138   :  { %v347_v4 = vadd.f32 %v345_v51, %v682_v43  ;;  %v348_v41 = vadd.f32 %v346_v10, %v684_v47 }
 0x13a   :  { %v363_v40 = vadd.f32 %v361_v52, %v347_v4  ;;  %v364_v37 = vadd.f32 %v362_v53, %v348_v41 }
 0x13c   :  { %v365_v57 = vadd.f32 %v363_v40, %v233_v54  ;;  %v366_v58 = vadd.f32 %v364_v37, %v234_v56 }
 0x13e   :  { %367 = vst [vmem:[#allocation10] sm:$0xff] %v365_v57  ;;  %368 = vst [vmem:[#allocation10 + $0x8] sm:$0xff] %v366_v58 }
 0x13f   :  { %492 = shalt.err (!%p489_p5)
}
 0x140   :  { %378 = dma.vmem_to_hbm [thread:$0]  %s376_s15, 256, %s741_s5, [#allocation4]  }
 0x141   :  { %507 = dma.done.wait [#allocation4], 256  }
 0x142   :  { %508 = vsyncadd [#allocation4], 4294967040 }
 0x143   :  { %382 = vsyncpa [#allocation3], 1 }
 0x144   :  { %383 = vsyncpa [#allocation8], 1 }
 0x145   :  { %384 = vsyncpa [#allocation4], 1 }
 0x146   :  { %385 = vsyncpa [#allocation5], 1 }

</bundles_post_ra>
